<compile_context>
chip_gen: v7x
topology: tpu7x:2x2x1
jax: 0.10.0
libtpu: 0.0.40
codegen_flags: <defaults>
</compile_context>

<pallas_src>
import functools

import jax
import jax.numpy as jnp
from jax.experimental import pallas as pl
from jax.experimental.pallas import tpu as pltpu


def _cdiv(a, b):
    return -(-a // b)


def _round_up(a, b):
    return _cdiv(a, b) * b


def _conv_bn_relu_kernel(x_ref, w_ref, shift_ref, o_ref, *, k, stride, th, folded):
    """One (batch, Cout-tile, Hout-tile) cell per grid step.

    x_ref:     (1, rows, Wx, Cx)   spatially pre-padded input (bf16), resident per batch.
                                   folded:   Wx = Wout, Cx = k*Cin (kw space-to-depth)
                                   unfolded: Wx = Wp,   Cx = Cin
    w_ref:     (taps, Cx, TCO)     BN-scale-folded weights (bf16); taps = k (folded) / k*k.
                                   Resident across all Hout tiles of a Cout block.
    shift_ref: (1, TCO)            folded BN shift (+ conv bias), f32.
    o_ref:     (1, th, Wout, TCO)  output tile (lane-dense Cout).
    """
    wout = o_ref.shape[2]
    tco = o_ref.shape[3]
    hb = pl.program_id(2)
    cx = x_ref.shape[3]
    m = th * wout

    # Rows of the padded input needed by this Hout tile (includes the k-1 halo rows).
    row_span = (th - 1) * stride + k
    row_start = pl.multiple_of(hb * (th * stride), th * stride)
    x = x_ref[0, pl.ds(row_start, row_span)]           # (row_span, Wx, Cx), bf16

    acc = jnp.zeros((m, tco), jnp.float32)
    taps = k if folded else k * k
    for t in range(taps):
        kh = t if folded else t // k
        kw = 0 if folded else t % k
        if folded:
            if stride == 1:
                patch = x[kh:kh + th]                   # (th, Wout, k*Cin)
            else:
                # TODO(synk): stride>1 H-phase space-to-depth in the wrapper would make
                # this a dense slice; W-stride is already folded away by width lowering.
                patch = jax.lax.slice(
                    x, (kh, 0, 0),
                    (kh + (th - 1) * stride + 1, wout, cx),
                    (stride, 1, 1))
        else:
            if stride == 1:
                patch = x[kh:kh + th, kw:kw + wout, :]
            else:
                # TODO(synk): stride>1 space-to-depth in the wrapper for the unfolded
                # (large-Cin) path; this strided W slice is a relayout per tap.
                patch = jax.lax.slice(
                    x, (kh, kw, 0),
                    (kh + (th - 1) * stride + 1, kw + (wout - 1) * stride + 1, cx),
                    (stride, stride, 1))
        lhs = patch.reshape(m, cx)                      # (m, Cx), bf16
        acc = acc + jnp.dot(lhs, w_ref[t], preferred_element_type=jnp.float32)

    y = jnp.maximum(acc + shift_ref[...], 0.0)          # fused BN shift / bias + ReLU
    o_ref[0] = y.reshape(th, wout, tco).astype(o_ref.dtype)


def convolution_forward(
    x_nchw,
    weight,                      # (Cout, Cin, k, k)  -- PyTorch OIHW layout
    bias,                        # (Cout,) or None
    gamma, beta,                 # BN affine params (Cout,)
    running_mean, running_var,   # BN running stats (Cout,)
    *,
    stride=1,
    with_bn=True,
    eps=1e-5,
    out_dtype=jnp.bfloat16,      # bf16 output halves HBM writeback
):
    n, cin, h, w = x_nchw.shape
    cout, _, k, _ = weight.shape
    pad = (k - 1) // 2
    hout = (h + 2 * pad - k) // stride + 1
    wout = (w + 2 * pad - k) // stride + 1

    # ---- fold BN (inference) + conv bias into per-channel (scale, shift) -----------
    bias_f = (bias.astype(jnp.float32) if bias is not None
              else jnp.zeros((cout,), jnp.float32))
    if with_bn:
        inv_std = 1.0 / jnp.sqrt(running_var.astype(jnp.float32) + eps)
        scale = gamma.astype(jnp.float32) * inv_std
        shift = beta.astype(jnp.float32) + (bias_f - running_mean.astype(jnp.float32)) * scale
    else:
        scale = jnp.ones((cout,), jnp.float32)
        shift = bias_f

    # ---- Cout tiling: lane-dense; 256-wide tiles when that adds no extra padding ----
    cout_p = _round_up(cout, 128)
    tco = 256 if (cout_p >= 256 and cout_p % 256 == 0) else 128
    n_cb = cout_p // tco

    # ---- Hout tiling: target M = th*Wout ~ 256-512 (keeps the f32 acc <= ~256 KiB) --
    m_target = 512 if tco == 128 else 256
    th_max = max(1, m_target // max(wout, 1))
    n_hb = _cdiv(hout, min(th_max, hout))
    th = _cdiv(hout, n_hb)                              # balanced; hout_p - hout < n_hb
    hout_p = n_hb * th

    # ---- activations: NCHW -> NHWC, spatial zero-pad (+ rows for hout_p), bf16 ------
    # TODO(synk): network-level, keep activations NHWC/bf16 between layers so these
    #             boundary transposes / pads disappear.
    x_nhwc = jnp.transpose(x_nchw, (0, 2, 3, 1)).astype(jnp.bfloat16)
    rows_needed = (hout_p - 1) * stride + k
    pad_bottom = pad + max(0, rows_needed - (h + 2 * pad))
    x_pad = jnp.pad(x_nhwc, ((0, 0), (pad, pad_bottom), (pad, pad), (0, 0)))
    rows_total = x_pad.shape[1]

    # ---- small-Cin: kw space-to-depth (width lowering) -> kernel contracts over k*Cin
    folded = (k * cin) <= 128
    if folded:
        cols = [x_pad[:, :, kw:kw + (wout - 1) * stride + 1:stride, :] for kw in range(k)]
        x_in = jnp.concatenate(cols, axis=-1)           # (N, rows, Wout, k*Cin)
        wx, cx, taps = wout, k * cin, k
    else:
        x_in = x_pad                                     # (N, rows, Wp, Cin)
        wx, cx, taps = w + 2 * pad, cin, k * k

    # ---- weights: OIHW -> (taps, Cx, Cout); fold BN scale; pad Cout; bf16 -----------
    w_f = weight.astype(jnp.float32) * scale[:, None, None, None]
    w_t = jnp.transpose(w_f, (2, 3, 1, 0)).reshape(taps, cx, cout)   # (kh[,kw]*Cin, Cout)
    w_t = jnp.pad(w_t, ((0, 0), (0, 0), (0, cout_p - cout))).astype(jnp.bfloat16)
    shift_p = jnp.pad(shift, (0, cout_p - cout)).reshape(1, cout_p)

    # ---- VMEM budget: actual tile footprint + headroom, clamped below physical ------
    out_isz = jnp.dtype(out_dtype).itemsize
    img_b = 2 * rows_total * _round_up(wx, 8) * _round_up(cx, 128) * 2   # double-buffered
    wgt_b = 2 * taps * _round_up(cx, 8) * tco * 2
    out_b = 2 * th * _round_up(wout, 8) * tco * out_isz
    acc_b = th * wout * tco * 4
    needed = img_b + wgt_b + out_b + acc_b + (1 << 20)
    vmem_cap = 64 * 1024 * 1024                          # conservative default (v7x)
    try:
        vmem_cap = int(pltpu.get_tpu_info().vmem_capacity_bytes)
    except Exception:
        pass
    vmem_limit = int(max(32 * 1024 * 1024,
                         min(needed + 16 * 1024 * 1024, vmem_cap - 8 * 1024 * 1024)))
    # TODO(synk): for very large images on v7x (64 MiB VMEM) switch the resident image to
    #             a per-Hout-tile halo DMA (memory_space=pl.ANY + make_async_copy) or
    #             pipeline_mode=pl.Buffered(1) so VMEM usage is O(tile), not O(image).

    kernel = functools.partial(_conv_bn_relu_kernel, k=k, stride=stride, th=th, folded=folded)

    out_nhwc = pl.pallas_call(
        kernel,
        out_shape=jax.ShapeDtypeStruct((n, hout_p, wout, cout_p), out_dtype),
        grid_spec=pltpu.PrefetchScalarGridSpec(
            num_scalar_prefetch=0,
            # (batch, Cout-block, Hout-block): hb innermost so weight/shift tiles stay
            # resident across all Hout tiles of a Cout block.
            grid=(n, n_cb, n_hb),
            in_specs=[
                # whole (width-lowered) padded image per batch element; block index only
                # depends on b, so it stays resident while cb/hb iterate.
                pl.BlockSpec((1, rows_total, wx, cx), lambda b, cb, hb: (b, 0, 0, 0)),
                pl.BlockSpec((taps, cx, tco), lambda b, cb, hb: (0, 0, cb)),
                pl.BlockSpec((1, tco), lambda b, cb, hb: (0, cb)),
            ],
            out_specs=pl.BlockSpec((1, th, wout, tco), lambda b, cb, hb: (b, hb, 0, cb)),
        ),
        compiler_params=pltpu.CompilerParams(
            dimension_semantics=("parallel", "parallel", "parallel"),
            vmem_limit_bytes=vmem_limit,
        ),
    )(x_in, w_t, shift_p)

    # drop the Hout/Cout padding, NHWC -> NCHW to match the PyTorch output convention.
    return jnp.transpose(out_nhwc[:, :hout, :, :cout], (0, 3, 1, 2))


def _reference(x, weight, gamma, beta, running_mean, running_var, stride,
               eps=1e-5, quantize_inputs=False):
    """Pure-JAX reference (conv + eval-mode BN + relu).

    quantize_inputs=True mirrors the kernel's bf16 MXU inputs (accumulation stays f32).
    """
    k = weight.shape[-1]
    pad = (k - 1) // 2
    inv_std = 1.0 / jnp.sqrt(running_var.astype(jnp.float32) + eps)
    scale = gamma.astype(jnp.float32) * inv_std
    shift = beta.astype(jnp.float32) - running_mean.astype(jnp.float32) * scale

    w_fold = weight.astype(jnp.float32) * scale[:, None, None, None]
    xf = x.astype(jnp.float32)
    if quantize_inputs:
        w_fold = w_fold.astype(jnp.bfloat16).astype(jnp.float32)
        xf = xf.astype(jnp.bfloat16).astype(jnp.float32)

    conv = jax.lax.conv_general_dilated(
        xf, w_fold,
        window_strides=(stride, stride),
        padding=((pad, pad), (pad, pad)),
        dimension_numbers=("NCHW", "OIHW", "NCHW"),
        precision=jax.lax.Precision.HIGHEST,
    )
    return jnp.maximum(conv + shift[None, :, None, None], 0.0)


if __name__ == "__main__":
    def run_case(name, n, cin, h, w, k, cout, stride):
        key = jax.random.PRNGKey(0)
        kx, kw_, kg, kb, km, kv = jax.random.split(key, 6)
        x = jax.random.normal(kx, (n, cin, h, w), jnp.float32)
        weight = jax.random.normal(kw_, (cout, cin, k, k), jnp.float32) * 0.1
        gamma = 1.0 + 0.1 * jax.random.normal(kg, (cout,), jnp.float32)
        beta = 0.1 * jax.random.normal(kb, (cout,), jnp.float32)
        rm = 0.1 * jax.random.normal(km, (cout,), jnp.float32)
        rv = jnp.abs(1.0 + 0.1 * jax.random.normal(kv, (cout,), jnp.float32))

        pad = (k - 1) // 2
        hout = (h + 2 * pad - k) // stride + 1
        wout = (w + 2 * pad - k) // stride + 1

        out = convolution_forward(x, weight, None, gamma, beta, rm, rv,
                                  stride=stride, with_bn=True)
        out = jax.block_until_ready(out)
        assert out.shape == (n, cout, hout, wout), (name, out.shape)
        out_f32 = out.astype(jnp.float32)

        # Tight check: reference with the same bf16-rounded MXU inputs + bf16 output.
        ref_q = _reference(x, weight, gamma, beta, rm, rv, stride, quantize_inputs=True)
        ref_q = ref_q.astype(jnp.bfloat16).astype(jnp.float32)
        err = float(jnp.max(jnp.abs(out_f32 - ref_q)))
        assert jnp.allclose(out_f32, ref_q, atol=2e-2, rtol=2e-2), (name, err)

        # Loose check against the full-f32 PyTorch-semantics reference
        # (tolerance accounts for bf16 MXU inputs and the bf16 output).
        ref_f = _reference(x, weight, gamma, beta, rm, rv, stride, quantize_inputs=False)
        assert jnp.allclose(out_f32, ref_f, atol=1e-1, rtol=1e-1), name

    # Small shapes consistent with convolution(k=3, inp_dim=4, out_dim=8).
    run_case("stem", n=2, cin=4, h=16, w=16, k=3, cout=8, stride=1)
    # Exercises multiple Hout blocks + balanced Hout-tile selection (folded path).
    run_case("hout_tiles", n=1, cin=8, h=40, w=16, k=3, cout=8, stride=1)
    # Exercises multiple Cout blocks and the unfolded (larger-Cin) path.
    run_case("wide", n=1, cin=48, h=8, w=8, k=3, cout=264, stride=1)

    print("KERNEL_OK")
</pallas_src>

<mosaic_0001>
module attributes {stable_mosaic.version = 11 : i64} {
  func.func @_conv_bn_relu_kernel(%arg0: i32, %arg1: i32, %arg2: i32, %arg3: memref<1x18x16x12xbf16, #tpu.memory_space<vmem>>, %arg4: memref<3x12x128xbf16, #tpu.memory_space<vmem>>, %arg5: memref<1x128xf32, #tpu.memory_space<vmem>>, %arg6: memref<1x16x16x128xbf16, #tpu.memory_space<vmem>>) attributes {dimension_semantics = [#tpu.dimension_semantics<parallel>, #tpu.dimension_semantics<parallel>, #tpu.dimension_semantics<parallel>], iteration_bounds = array<i64: 2, 1, 1>, scalar_prefetch = 0 : i64, scratch_operands = 0 : i64, tpu.core_type = #tpu.core_type<tc>, window_params = [{transform_indices = @transform_0, window_bounds = array<i64: 1, 18, 16, 12>}, {transform_indices = @transform_1, window_bounds = array<i64: 3, 12, 128>}, {transform_indices = @transform_2, window_bounds = array<i64: 1, 128>}, {transform_indices = @transform_3, window_bounds = array<i64: 1, 16, 16, 128>}]} {
    %c16_i32 = arith.constant 16 : i32
    %0 = arith.muli %arg2, %c16_i32 : i32
    %1 = tpu.assume_multiple %0, 16 : i32
    %c0 = arith.constant 0 : index
    %2 = arith.index_cast %1 : i32 to index
    %c0_0 = arith.constant 0 : index
    %c0_1 = arith.constant 0 : index
    %3 = vector.load %arg3[%c0, %2, %c0_0, %c0_1] : memref<1x18x16x12xbf16, #tpu.memory_space<vmem>>, vector<1x18x16x12xbf16>
    %4 = vector.shape_cast %3 : vector<1x18x16x12xbf16> to vector<18x16x12xbf16>
    %cst = arith.constant 0.000000e+00 : f32
    %5 = vector.broadcast %cst : f32 to vector<256x128xf32>
    %6 = vector.extract_strided_slice %4 {offsets = [0, 0, 0], sizes = [16, 16, 12], strides = [1, 1, 1]} : vector<18x16x12xbf16> to vector<16x16x12xbf16>
    %7 = vector.shape_cast %6 : vector<16x16x12xbf16> to vector<256x12xbf16>
    %c0_2 = arith.constant 0 : index
    %c0_3 = arith.constant 0 : index
    %c0_4 = arith.constant 0 : index
    %8 = vector.load %arg4[%c0_2, %c0_3, %c0_4] : memref<3x12x128xbf16, #tpu.memory_space<vmem>>, vector<1x12x128xbf16>
    %9 = vector.shape_cast %8 : vector<1x12x128xbf16> to vector<12x128xbf16>
    %cst_5 = arith.constant dense<0.000000e+00> : vector<256x128xf32>
    %10 = tpu.matmul %7, %9, %cst_5 {dimension_numbers = #tpu.dot_dimension_numbers<[1], [0], [0], [1], [0, 0, 1, 1], [], []>} : vector<256x12xbf16>, vector<12x128xbf16>, vector<256x128xf32> -> vector<256x128xf32>
    %11 = arith.addf %5, %10 : vector<256x128xf32>
    %12 = vector.extract_strided_slice %4 {offsets = [1, 0, 0], sizes = [16, 16, 12], strides = [1, 1, 1]} : vector<18x16x12xbf16> to vector<16x16x12xbf16>
    %13 = vector.shape_cast %12 : vector<16x16x12xbf16> to vector<256x12xbf16>
    %c1 = arith.constant 1 : index
    %c0_6 = arith.constant 0 : index
    %c0_7 = arith.constant 0 : index
    %14 = vector.load %arg4[%c1, %c0_6, %c0_7] : memref<3x12x128xbf16, #tpu.memory_space<vmem>>, vector<1x12x128xbf16>
    %15 = vector.shape_cast %14 : vector<1x12x128xbf16> to vector<12x128xbf16>
    %cst_8 = arith.constant dense<0.000000e+00> : vector<256x128xf32>
    %16 = tpu.matmul %13, %15, %cst_8 {dimension_numbers = #tpu.dot_dimension_numbers<[1], [0], [0], [1], [0, 0, 1, 1], [], []>} : vector<256x12xbf16>, vector<12x128xbf16>, vector<256x128xf32> -> vector<256x128xf32>
    %17 = arith.addf %11, %16 : vector<256x128xf32>
    %18 = vector.extract_strided_slice %4 {offsets = [2, 0, 0], sizes = [16, 16, 12], strides = [1, 1, 1]} : vector<18x16x12xbf16> to vector<16x16x12xbf16>
    %19 = vector.shape_cast %18 : vector<16x16x12xbf16> to vector<256x12xbf16>
    %c2 = arith.constant 2 : index
    %c0_9 = arith.constant 0 : index
    %c0_10 = arith.constant 0 : index
    %20 = vector.load %arg4[%c2, %c0_9, %c0_10] : memref<3x12x128xbf16, #tpu.memory_space<vmem>>, vector<1x12x128xbf16>
    %21 = vector.shape_cast %20 : vector<1x12x128xbf16> to vector<12x128xbf16>
    %cst_11 = arith.constant dense<0.000000e+00> : vector<256x128xf32>
    %22 = tpu.matmul %19, %21, %cst_11 {dimension_numbers = #tpu.dot_dimension_numbers<[1], [0], [0], [1], [0, 0, 1, 1], [], []>} : vector<256x12xbf16>, vector<12x128xbf16>, vector<256x128xf32> -> vector<256x128xf32>
    %23 = arith.addf %17, %22 : vector<256x128xf32>
    %c0_12 = arith.constant 0 : index
    %c0_13 = arith.constant 0 : index
    %24 = vector.load %arg5[%c0_12, %c0_13] : memref<1x128xf32, #tpu.memory_space<vmem>>, vector<1x128xf32>
    %25 = vector.broadcast %24 : vector<1x128xf32> to vector<256x128xf32>
    %26 = arith.addf %23, %25 : vector<256x128xf32>
    %cst_14 = arith.constant 0.000000e+00 : f32
    %27 = vector.broadcast %cst_14 : f32 to vector<256x128xf32>
    %28 = arith.maximumf %26, %27 : vector<256x128xf32>
    %29 = vector.shape_cast %28 : vector<256x128xf32> to vector<16x16x128xf32>
    %30 = arith.truncf %29 : vector<16x16x128xf32> to vector<16x16x128xbf16>
    %c0_15 = arith.constant 0 : index
    %c0_16 = arith.constant 0 : index
    %c0_17 = arith.constant 0 : index
    %c0_18 = arith.constant 0 : index
    %31 = vector.load %arg6[%c0_15, %c0_16, %c0_17, %c0_18] : memref<1x16x16x128xbf16, #tpu.memory_space<vmem>>, vector<1x16x16x128xbf16>
    %32 = vector.shape_cast %31 : vector<1x16x16x128xbf16> to vector<16x16x128xbf16>
    %33 = vector.shape_cast %30 : vector<16x16x128xbf16> to vector<1x16x16x128xbf16>
    tpu.vector_store %arg6[%c0_15, %c0_16, %c0_17, %c0_18], %33 {strides = array<i32>} : memref<1x16x16x128xbf16, #tpu.memory_space<vmem>>, vector<1x16x16x128xbf16>,
    return
  }
  func.func @transform_0(%arg0: i32, %arg1: i32, %arg2: i32) -> (i32, i32, i32, i32) {
    %c0_i32 = arith.constant 0 : i32
    %c0_i32_0 = arith.constant 0 : i32
    %c0_i32_1 = arith.constant 0 : i32
    %c0_i32_2 = arith.constant 0 : i32
    return %arg0, %c0_i32, %c0_i32_0, %c0_i32_1 : i32, i32, i32, i32
  }
  func.func @transform_1(%arg0: i32, %arg1: i32, %arg2: i32) -> (i32, i32, i32) {
    %c0_i32 = arith.constant 0 : i32
    %c0_i32_0 = arith.constant 0 : i32
    %c0_i32_1 = arith.constant 0 : i32
    return %c0_i32, %c0_i32_0, %arg1 : i32, i32, i32
  }
  func.func @transform_2(%arg0: i32, %arg1: i32, %arg2: i32) -> (i32, i32) {
    %c0_i32 = arith.constant 0 : i32
    %c0_i32_0 = arith.constant 0 : i32
    return %c0_i32, %arg1 : i32, i32
  }
  func.func @transform_3(%arg0: i32, %arg1: i32, %arg2: i32) -> (i32, i32, i32, i32) {
    %c0_i32 = arith.constant 0 : i32
    %c0_i32_0 = arith.constant 0 : i32
    return %arg0, %arg2, %c0_i32, %arg1 : i32, i32, i32, i32
  }
}

</mosaic_0001>

<bundles_post_ra>
// kernel: tpu_custom_call.1
= control target key start
LH: loop header
LB: loop body
LE: loop exit
PB: predicated region body
PF: predicated region fallthrough
CT: control target
= control target key end

     0   :  { %8 = vsyncpa [#allocation3], 0  ;;  %s2237_s0 = inlined_call_operand.vmem [shape: bf16[2,18,16,12], index: 0, kind: input, shape index: {}]   ;;  %s2238_s1 = inlined_call_operand.vmem [shape: bf16[3,12,128], index: 1, kind: input, shape index: {}]   ;;  %s2239_s2 = inlined_call_operand.vmem [shape: f32[1,128], index: 2, kind: input, shape index: {}]   ;;  %s2240_s3 = inlined_call_operand.hbm [shape: bf16[2,16,16,128], index: 3, kind: output, shape index: {}]  }
   0x1   :  { %10 = vsyncpa [#allocation3 + $0x1], 0  ;;  %s1966_s12 = smov 0   ;;  %s1968_s13 = smov 0  }
   0x2   :  { %s1970_s14 = smov 0   ;;  %s1972_s15 = smov 0  }
   0x3   :  { %s1974_s16 = smov 0   ;;  %s1976_s17 = smov 0  }
   0x4 LB: > { %s1313_s18 = sadd.s32 4294967295, %s1941_s17   ;;  %s1314_s19 = sadd.s32 4294967294, %s1941_s17   ;;  %s1941_s17 = sphi %s1976_s17, %s16_s17   ;;  %s1937_s16 = sphi %s1974_s16, %s2247_s16   ;;  %s1933_s15 = sphi %s1972_s15, %s2246_s15   ;;  %s1929_s14 = sphi %s1970_s14, %s2245_s14   ;;  %s1925_s13 = sphi %s1968_s13, %s2244_s13   ;;  %s1921_s12 = sphi %s1966_s12, %s2243_s12  }
   0x5   : > { %s35_s20 = sadd.s32 1, %s1937_s16  ;;  %s124_s21 = sadd.s32 1, %s1929_s14 }
   0x6   : > { %p37_p0 = scmp.ge.s32.totalorder %s35_s20, 2  ;;  %p134_p1 = scmp.ne.s32.totalorder %s1929_s14, %s1925_s13 }
   0x7   : > { %p135_p2 = scmp.eq.s32.totalorder %s1313_s18, 1  ;;  %p140_p3 = scmp.ne.s32.totalorder %s1925_s13, %s1921_s12 }
   0x8   : > { %s2249_s20 = smov (%p37_p0, %s35_s20), 0  ;;  %p141_p5 = scmp.eq.s32.totalorder %s1314_s19, 1 }
   0x9   : > { %p2006_p4 = por %p135_p2, %p134_p1  ;;  %s117_s23 = ssub.s32 %s1937_s16, %s2249_s20 }
   0xa   : > { %p1319_p6 = scmp.ge.s32.totalorder %s1941_s17, 1  ;;  %p122_p7 = scmp.eq.s32.totalorder %s117_s23, 0 }
   0xb   : > { %p2013_p8 = por %p141_p5, %p140_p3  ;;  %p180_p9 = scmp.lt.s32.totalorder %s1941_s17, 3 }
   0xc   : > { %s2019_s25 = scalar_select %p122_p7, %s1929_s14, %s124_s21  }
   0xd   : > { %p181_p10 = pnand %p1319_p6, %p180_p9 }
   0xe   : > { %v1842_v0 = vld [vmem:[%s2238_s1 + $0x8] sm:$0x3f] (!%p181_p10)   ;;  %vm404_vm0 = vcmask (!%p181_p10), 1045504   ;;  %p211_p11 = scmp.lt.s32.totalorder (!%p181_p10), %s1933_s15, 1  ;;  %v1843_v1 = vld [vmem:[%s2238_s1] sm:$0x3f] (!%p181_p10)  }
   0xf   : > { %184 = sbr.rel (%p181_p10) target bundleno = 355 (0x163), region = 32  ;;  %1780 = vmatprep.subr.msk.bf16.mxu1 (!%p181_p10), %vm404_vm0, %v1842_v0  ;;  %v406_v2 = vsel (!%p181_p10), %vm404_vm0, %v1842_v0, 0  ;;  %v1846_v3 = vld [vmem:[%s2238_s1 + $0x10] sm:$0x3f] (!%p181_p10)   ;;  %1781 = vmatprep.subr.msk.bf16.mxu0 (!%p181_p10), %vm404_vm0, %v1843_v1  ;;  %v583_v4 = vsel (!%p181_p10), %vm404_vm0, %v1843_v1, 0  ;;  %vm355_vm1 = vcmask (!%p181_p10), 97280  }
  0x10   : > { %1613 = vmatpush3.bf16.msra.mxu1 (!%p181_p10), %v406_v2  ;;  %1647 = vmatpush3.bf16.msra.mxu0 (!%p181_p10), %v583_v4  ;;  %v763_v8 = vsel (!%p181_p10), %vm404_vm0, %v1846_v3, 0  ;;  %v2121_v41 = vld [vmem:[%s2239_s2] ss:$0 sm:$0xff] (!%p181_p10)  ;;  %s208_s18 = sand.u32 (!%p181_p10), 1, %s1925_s13   ;;  %s1465_s23 = sshll.u32 (!%p181_p10), %s1933_s15, 11 }
  0x11   : > { %1782 = vmatprep.subr.msk.bf16.mxu1 (!%p181_p10), %vm404_vm0, %v1843_v1  ;;  %1783 = vmatprep.subr.msk.bf16.mxu0 (!%p181_p10), %vm404_vm0, %v1846_v3  ;;  %s1320_s19 = sshll.u32 (!%p181_p10), %s208_s18, 7  ;;  %s2183_s29 = scalar_lea.hbm (!%p181_p10), %s2240_s3, %s1465_s23 }
  0x12   : > { %s2130_s21 = scalar_lea.vmem (!%p181_p10), [#allocation2], %s1320_s19  ;;  %s1943_s4 = smov (!%p181_p10), [#allocation2]  }
  0x13   : > { %s1207_s26 = sshll.u32 (!%p181_p10), %s2130_s21, 4  ;;  %s1867_s5 = sshll.u32 (!%p181_p10), %s1943_s4, 4  ;;  %s2185_s26 = int_to_ptr.vmem [resolvable:$true] %s1207_s26  ;;  %s1868_s5 = int_to_ptr.vmem [resolvable:$false] %s1867_s5 }
  0x14   : > { %p1870_p1 = scmp.lt.s32.totalorder (!%p181_p10), %s2185_s26, %s1868_s5 }
  0x16   : > { %s212_s30 = scalar_select %p211_p11, %s1933_s15, 1 }
  0x17   : > { %s2191_s15 = scalar_lea.sflag [#allocation3], %s208_s18 }
  0x18   : > { %s1784_s6 = smul.u32 144, %s212_s30  ;;  %s1863_s30 = scalar_lea.vmem %s2185_s26, 2048 }
  0x19   : > { %p1864_p12 = scmp.ne.s32.totalorder %s2185_s26, %s1863_s30 }
  0x1a   : > { %s2041_s9 = scalar_lea.vmem %s2237_s0, %s1784_s6  ;;  %s1869_s6 = scalar_lea.vmem %s1868_s5, 4096 }
  0x1b   : > { %v1844_v5 = vld [vmem:[%s2041_s9 + $0x8] sm:$0xff]   ;;  %v1845_v6 = vld [vmem:[%s2041_s9] sm:$0xff]   ;;  %v1847_v7 = vld [vmem:[%s2041_s9 + $0x10] sm:$0xff]   ;;  %p1865_p13 = pnand %p1864_p12, %p2006_p4  ;;  %p1871_p2 = scmp.lt.s32.totalorder %s1869_s6, %s1863_s30 }
  0x1c   : > { %1614 = vmatprep.mubr.msk.bf16.mxu1 %vm355_vm1, %v1844_v5  ;;  %1648 = vmatprep.mubr.msk.bf16.mxu0 %vm355_vm1, %v1845_v6  ;;  %v1848_v9 = vld [vmem:[%s2041_s9 + $0x18] sm:$0xff]   ;;  %v1849_v10 = vld [vmem:[%s2041_s9 + $0x20] sm:$0xff]   ;;  %v1850_v11 = vld [vmem:[%s2041_s9 + $0x28] sm:$0xff]  }
  0x1d   : > { %1615 = vmatmul.mubr.msk.bf16.vlgmr.msra.gmra.mrb[0].mxu1 %vm355_vm1, %v1847_v7  ;;  %1649 = vmatmul.mubr.msk.bf16.vlgmr.msra.gmra.mrb[0].mxu0 %vm355_vm1, %v1844_v5  ;;  %v1851_v12 = vld [vmem:[%s2041_s9 + $0x30] sm:$0xff]   ;;  %v1852_v13 = vld [vmem:[%s2041_s9 + $0x38] sm:$0xff]   ;;  %v1853_v14 = vld [vmem:[%s2041_s9 + $0x40] sm:$0xff]   ;;  %p1866_p0 = pneg %p1865_p13  ;;  %p1872_p3 = por %p1871_p2, %p1870_p1 }
  0x1e   : > { %1715 = vmatpush3.bf16.msra.mxu1 %v583_v4  ;;  %1681 = vmatpush3.bf16.msra.mxu0 %v763_v8  ;;  %v1854_v15 = vld [vmem:[%s2041_s9 + $0x48] sm:$0xff]   ;;  %v1855_v16 = vld [vmem:[%s2041_s9 + $0x50] sm:$0xff]   ;;  %v1856_v17 = vld [vmem:[%s2041_s9 + $0x58] sm:$0xff]  }
  0x1f   : > { %1618 = vmatprep.mubr.msk.bf16.mxu1 %vm355_vm1, %v1848_v9  ;;  %1652 = vmatprep.mubr.msk.bf16.mxu0 %vm355_vm1, %v1847_v7  ;;  %v1857_v18 = vld [vmem:[%s2041_s9 + $0x60] sm:$0xff]   ;;  %v1858_v19 = vld [vmem:[%s2041_s9 + $0x68] sm:$0xff]   ;;  %v1859_v20 = vld [vmem:[%s2041_s9 + $0x70] sm:$0xff]   ;;  %p1873_p5 = pnand %p1872_p3, %p1866_p0 }
  0x20   : > { %v1860_v21 = vld [vmem:[%s2041_s9 + $0x78] sm:$0xff]   ;;  %v1861_v22 = vld [vmem:[%s2041_s9 + $0x80] sm:$0xff]   ;;  %v1862_v23 = vld [vmem:[%s2041_s9 + $0x88] sm:$0xff]  }
  0x25   : > { %1619 = vmatmul.mubr.msk.bf16.gmra.mrb[4].mxu1 %vm355_vm1, %v1849_v10  ;;  %1653 = vmatmul.mubr.msk.bf16.gmra.mrb[4].mxu0 %vm355_vm1, %v1848_v9 }
  0x26   : > { %1622 = vmatprep.mubr.msk.bf16.mxu1 %vm355_vm1, %v1850_v11  ;;  %1656 = vmatprep.mubr.msk.bf16.mxu0 %vm355_vm1, %v1849_v10 }
  0x2d   : > { %1623 = vmatmul.mubr.msk.bf16.gmra.mrb[8].mxu1 %vm355_vm1, %v1851_v12  ;;  %1657 = vmatmul.mubr.msk.bf16.gmra.mrb[8].mxu0 %vm355_vm1, %v1850_v11 }
  0x2e   : > { %1626 = vmatprep.mubr.msk.bf16.mxu1 %vm355_vm1, %v1852_v13  ;;  %1660 = vmatprep.mubr.msk.bf16.mxu0 %vm355_vm1, %v1851_v12 }
  0x35   : > { %1627 = vmatmul.mubr.msk.bf16.gmra.mrb[12].mxu1 %vm355_vm1, %v1853_v14  ;;  %1661 = vmatmul.mubr.msk.bf16.gmra.mrb[12].mxu0 %vm355_vm1, %v1852_v13 }
  0x36   : > { %1630 = vmatprep.mubr.msk.bf16.mxu1 %vm355_vm1, %v1854_v15  ;;  %1682 = vmatprep.mubr.msk.bf16.mxu0 %vm355_vm1, %v1847_v7 }
  0x3d   : > { %1631 = vmatmul.mubr.msk.bf16.gmra.mrb[16].mxu1 %vm355_vm1, %v1855_v16  ;;  %1683 = vmatmul.mubr.msk.bf16.vlgmr.msra.gmra.mrb[0].mxu0 %vm355_vm1, %v1848_v9 }
  0x3e   : > { %1634 = vmatprep.mubr.msk.bf16.mxu1 %vm355_vm1, %v1856_v17  ;;  %1686 = vmatprep.mubr.msk.bf16.mxu0 %vm355_vm1, %v1849_v10 }
  0x45   : > { %1635 = vmatmul.mubr.msk.bf16.gmra.mrb[20].mxu1 %vm355_vm1, %v1857_v18  ;;  %1687 = vmatmul.mubr.msk.bf16.gmra.mrb[4].mxu0 %vm355_vm1, %v1850_v11 }
  0x46   : > { %1638 = vmatprep.mubr.msk.bf16.mxu1 %vm355_vm1, %v1858_v19  ;;  %1690 = vmatprep.mubr.msk.bf16.mxu0 %vm355_vm1, %v1851_v12 }
  0x4d   : > { %1639 = vmatmul.mubr.msk.bf16.gmra.mrb[24].mxu1 %vm355_vm1, %v1859_v20  ;;  %1691 = vmatmul.mubr.msk.bf16.gmra.mrb[8].mxu0 %vm355_vm1, %v1852_v13 }
  0x4e   : > { %1642 = vmatprep.mubr.msk.bf16.mxu1 %vm355_vm1, %v1860_v21  ;;  %1694 = vmatprep.mubr.msk.bf16.mxu0 %vm355_vm1, %v1853_v14 }
  0x55   : > { %1643 = vmatmul.mubr.msk.bf16.gmra.mrb[28].mxu1 %vm355_vm1, %v1861_v22  ;;  %1695 = vmatmul.mubr.msk.bf16.gmra.mrb[12].mxu0 %vm355_vm1, %v1854_v15 }
  0x56   : > { %1664 = vmatprep.mubr.msk.bf16.mxu1 %vm355_vm1, %v1853_v14  ;;  %1698 = vmatprep.mubr.msk.bf16.mxu0 %vm355_vm1, %v1855_v16 }
  0x5d   : > { %1665 = vmatmul.mubr.msk.bf16.vlgmr.msra.gmra.mrb[16].mxu1 %vm355_vm1, %v1854_v15  ;;  %1699 = vmatmul.mubr.msk.bf16.gmra.mrb[16].mxu0 %vm355_vm1, %v1856_v17 }
  0x5e   : > { %1668 = vmatprep.mubr.msk.bf16.mxu1 %vm355_vm1, %v1855_v16  ;;  %1702 = vmatprep.mubr.msk.bf16.mxu0 %vm355_vm1, %v1857_v18 }
  0x65   : > { %1669 = vmatmul.mubr.msk.bf16.gmra.mrb[20].mxu1 %vm355_vm1, %v1856_v17  ;;  %1703 = vmatmul.mubr.msk.bf16.gmra.mrb[20].mxu0 %vm355_vm1, %v1858_v19 }
  0x66   : > { %1672 = vmatprep.mubr.msk.bf16.mxu1 %vm355_vm1, %v1857_v18  ;;  %1706 = vmatprep.mubr.msk.bf16.mxu0 %vm355_vm1, %v1859_v20 }
  0x6d   : > { %1673 = vmatmul.mubr.msk.bf16.gmra.mrb[24].mxu1 %vm355_vm1, %v1858_v19  ;;  %1707 = vmatmul.mubr.msk.bf16.gmra.mrb[24].mxu0 %vm355_vm1, %v1860_v21 }
  0x6e   : > { %1676 = vmatprep.mubr.msk.bf16.mxu1 %vm355_vm1, %v1859_v20  ;;  %1710 = vmatprep.mubr.msk.bf16.mxu0 %vm355_vm1, %v1861_v22 }
  0x75   : > { %1677 = vmatmul.mubr.msk.bf16.gmra.mrb[28].mxu1 %vm355_vm1, %v1860_v21  ;;  %1711 = vmatmul.mubr.msk.bf16.gmra.mrb[28].mxu0 %vm355_vm1, %v1862_v23 }
  0xf0   : > { %v1616_v24 = vpop.f32.mrb[0].mxu1 }
  0xf1   : > { %v442_v25 = vpop.f32.mrb[1].mxu1 }
  0xf2   : > { %v1617_v26 = vpop.f32.mrb[2].mxu1 }
  0xf3   : > { %v445_v27 = vpop.f32.mrb[3].mxu1 }
  0xf8   : > { %v1620_v28 = vpop.f32.mrb[4].mxu1 }
  0xf9   : > { %v458_v29 = vpop.f32.mrb[5].mxu1 }
  0xfa   : > { %v1621_v30 = vpop.f32.mrb[6].mxu1 }
  0xfb   : > { %v461_v31 = vpop.f32.mrb[7].mxu1 }
 0x100   : > { %v1624_v32 = vpop.f32.mrb[8].mxu1 }
 0x101   : > { %v474_v33 = vpop.f32.mrb[9].mxu1 }
 0x102   : > { %v1625_v34 = vpop.f32.mrb[10].mxu1 }
 0x103   : > { %v477_v35 = vpop.f32.mrb[11].mxu1 }
 0x108   : > { %v2110_v36 = vpop.f32.mrb[12].mxu1 }
 0x109   : > { %v2112_v37 = vpop.f32.mrb[13].mxu1 }
 0x10a   : > { %v2114_v38 = vpop.f32.mrb[14].mxu1 }
 0x10b   : > { %v2116_v39 = vpop.f32.mrb[15].mxu1 }
 0x110   : > { %v1684_v40 = vpop.f32.mrb[0].mxu0 }
 0x111   : > { %v1716_v42 = vadd.f32 %v1684_v40, %v1616_v24  ;;  %v799_v43 = vpop.f32.mrb[1].mxu0 }
 0x112   : > { %v1717_v44 = vadd.f32 %v799_v43, %v442_v25  ;;  %v1685_v45 = vpop.f32.mrb[2].mxu0 }
 0x113   : > { %v967_v46 = vadd.f32 %v1716_v42, %v2121_v41  ;;  %v1718_v47 = vadd.f32 %v1685_v45, %v1617_v26  ;;  %v802_v48 = vpop.f32.mrb[3].mxu0 }
 0x114   : > { %v965_v49 = vadd.f32 %v1717_v44, %v2121_v41  ;;  %v1719_v50 = vadd.f32 %v802_v48, %v445_v27 }
 0x115   : > { %v968_v51 = vadd.f32 %v1718_v47, %v2121_v41  ;;  %v999_v53 = vmax.f32 %v967_v46, 0.0 }
 0x116   : > { %v966_v52 = vadd.f32 %v1719_v50, %v2121_v41  ;;  %v997_v55 = vmax.f32 %v965_v49, 0.0 }
 0x117   : > { %v1000_v54 = vmax.f32 %v968_v51, 0.0 }
 0x118   : > { %v998_v56 = vmax.f32 %v966_v52, 0.0  ;;  %v1688_v57 = vpop.f32.mrb[4].mxu0 }
 0x119   : > { %v1474_v58 = vpack.c.bf16 %v1000_v54, %v999_v53  ;;  %v1720_v59 = vadd.f32 %v1688_v57, %v1620_v28  ;;  %v815_v60 = vpop.f32.mrb[5].mxu0 }
 0x11a   : > { %v1469_v61 = vpack.c.bf16 %v998_v56, %v997_v55  ;;  %v1721_v62 = vadd.f32 %v815_v60, %v458_v29  ;;  %v1689_v63 = vpop.f32.mrb[6].mxu0 }
 0x11b   : > { %1546 = vst [vmem:[%s2130_s21 + $0x8] sm:$0xff] %v1474_v58   ;;  %v971_v0 = vadd.f32 %v1720_v59, %v2121_v41  ;;  %v1722_v1 = vadd.f32 %v1689_v63, %v1621_v30  ;;  %v818_v2 = vpop.f32.mrb[7].mxu0 }
 0x11c   : > { %1470 = vst [vmem:[%s2130_s21] sm:$0xff] %v1469_v61   ;;  %v969_v3 = vadd.f32 %v1721_v62, %v2121_v41  ;;  %v1723_v4 = vadd.f32 %v818_v2, %v461_v31 }
 0x11d   : > { %v972_v5 = vadd.f32 %v1722_v1, %v2121_v41  ;;  %v1003_v7 = vmax.f32 %v971_v0, 0.0 }
 0x11e   : > { %v970_v6 = vadd.f32 %v1723_v4, %v2121_v41  ;;  %v1001_v9 = vmax.f32 %v969_v3, 0.0 }
 0x11f   : > { %v1004_v8 = vmax.f32 %v972_v5, 0.0 }
 0x120   : > { %v1002_v10 = vmax.f32 %v970_v6, 0.0  ;;  %v1692_v11 = vpop.f32.mrb[8].mxu0 }
 0x121   : > { %v1484_v12 = vpack.c.bf16 %v1004_v8, %v1003_v7  ;;  %v1724_v13 = vadd.f32 %v1692_v11, %v1624_v32  ;;  %v831_v14 = vpop.f32.mrb[9].mxu0 }
 0x122   : > { %v1479_v15 = vpack.c.bf16 %v1002_v10, %v1001_v9  ;;  %v1725_v16 = vadd.f32 %v831_v14, %v474_v33  ;;  %v1693_v17 = vpop.f32.mrb[10].mxu0 }
 0x123   : > { %1548 = vst [vmem:[%s2130_s21 + $0x18] sm:$0xff] %v1484_v12   ;;  %v975_v18 = vadd.f32 %v1724_v13, %v2121_v41  ;;  %v1726_v19 = vadd.f32 %v1693_v17, %v1625_v34  ;;  %v834_v20 = vpop.f32.mrb[11].mxu0 }
 0x124   : > { %1547 = vst [vmem:[%s2130_s21 + $0x10] sm:$0xff] %v1479_v15   ;;  %v973_v21 = vadd.f32 %v1725_v16, %v2121_v41  ;;  %v1727_v22 = vadd.f32 %v834_v20, %v477_v35 }
 0x125   : > { %v976_v23 = vadd.f32 %v1726_v19, %v2121_v41  ;;  %v1007_v25 = vmax.f32 %v975_v18, 0.0 }
 0x126   : > { %v974_v24 = vadd.f32 %v1727_v22, %v2121_v41  ;;  %v1005_v27 = vmax.f32 %v973_v21, 0.0 }
 0x127   : > { %v1008_v26 = vmax.f32 %v976_v23, 0.0 }
 0x128   : > { %v1006_v28 = vmax.f32 %v974_v24, 0.0  ;;  %v1696_v29 = vpop.f32.mrb[12].mxu0 }
 0x129   : > { %v1494_v30 = vpack.c.bf16 %v1008_v26, %v1007_v25  ;;  %v1728_v31 = vadd.f32 %v1696_v29, %v2110_v36  ;;  %v847_v32 = vpop.f32.mrb[13].mxu0 }
 0x12a   : > { %v1489_v33 = vpack.c.bf16 %v1006_v28, %v1005_v27  ;;  %v1729_v34 = vadd.f32 %v847_v32, %v2112_v37  ;;  %v1697_v40 = vpop.f32.mrb[14].mxu0 }
 0x12b   : > { %1550 = vst [vmem:[%s2130_s21 + $0x28] sm:$0xff] %v1494_v30   ;;  %v979_v35 = vadd.f32 %v1728_v31, %v2121_v41  ;;  %v1730_v42 = vadd.f32 %v1697_v40, %v2114_v38  ;;  %v850_v43 = vpop.f32.mrb[15].mxu0 }
 0x12c   : > { %1549 = vst [vmem:[%s2130_s21 + $0x20] sm:$0xff] %v1489_v33   ;;  %v977_v44 = vadd.f32 %v1729_v34, %v2121_v41  ;;  %v1731_v45 = vadd.f32 %v850_v43, %v2116_v39 }
 0x12d   : > { %v980_v46 = vadd.f32 %v1730_v42, %v2121_v41  ;;  %v1011_v47 = vmax.f32 %v979_v35, 0.0 }
 0x12e   : > { %v978_v36 = vadd.f32 %v1731_v45, %v2121_v41  ;;  %v1009_v37 = vmax.f32 %v977_v44, 0.0 }
 0x12f   : > { %v1012_v48 = vmax.f32 %v980_v46, 0.0 }
 0x130   : > { %v1010_v49 = vmax.f32 %v978_v36, 0.0  ;;  %v1666_v50 = vpop.f32.mrb[16].mxu1  ;;  %v1700_v51 = vpop.f32.mrb[16].mxu0 }
 0x131   : > { %v1504_v52 = vpack.c.bf16 %v1012_v48, %v1011_v47  ;;  %v1732_v38 = vadd.f32 %v1700_v51, %v1666_v50  ;;  %v683_v53 = vpop.f32.mrb[17].mxu1  ;;  %v863_v54 = vpop.f32.mrb[17].mxu0 }
 0x132   : > { %v1499_v55 = vpack.c.bf16 %v1010_v49, %v1009_v37  ;;  %v1733_v56 = vadd.f32 %v863_v54, %v683_v53  ;;  %v1667_v57 = vpop.f32.mrb[18].mxu1  ;;  %v1701_v39 = vpop.f32.mrb[18].mxu0 }
 0x133   : > { %1552 = vst [vmem:[%s2130_s21 + $0x38] sm:$0xff] %v1504_v52   ;;  %v983_v58 = vadd.f32 %v1732_v38, %v2121_v41  ;;  %v1734_v59 = vadd.f32 %v1701_v39, %v1667_v57  ;;  %v686_v60 = vpop.f32.mrb[19].mxu1  ;;  %v866_v61 = vpop.f32.mrb[19].mxu0 }
 0x134   : > { %1551 = vst [vmem:[%s2130_s21 + $0x30] sm:$0xff] %v1499_v55   ;;  %v981_v62 = vadd.f32 %v1733_v56, %v2121_v41  ;;  %v1735_v63 = vadd.f32 %v866_v61, %v686_v60 }
 0x135   : > { %v984_v0 = vadd.f32 %v1734_v59, %v2121_v41  ;;  %v1015_v2 = vmax.f32 %v983_v58, 0.0 }
 0x136   : > { %v982_v1 = vadd.f32 %v1735_v63, %v2121_v41  ;;  %v1013_v4 = vmax.f32 %v981_v62, 0.0 }
 0x137   : > { %v1016_v3 = vmax.f32 %v984_v0, 0.0 }
 0x138   : > { %v1014_v5 = vmax.f32 %v982_v1, 0.0  ;;  %v1670_v6 = vpop.f32.mrb[20].mxu1  ;;  %v1704_v7 = vpop.f32.mrb[20].mxu0 }
 0x139   : > { %v1514_v8 = vpack.c.bf16 %v1016_v3, %v1015_v2  ;;  %v1736_v9 = vadd.f32 %v1704_v7, %v1670_v6  ;;  %v699_v10 = vpop.f32.mrb[21].mxu1  ;;  %v879_v11 = vpop.f32.mrb[21].mxu0 }
 0x13a   : > { %v1509_v12 = vpack.c.bf16 %v1014_v5, %v1013_v4  ;;  %v1737_v13 = vadd.f32 %v879_v11, %v699_v10  ;;  %v1671_v14 = vpop.f32.mrb[22].mxu1  ;;  %v1705_v15 = vpop.f32.mrb[22].mxu0 }
 0x13b   : > { %1554 = vst [vmem:[%s2130_s21 + $0x48] sm:$0xff] %v1514_v8   ;;  %v987_v16 = vadd.f32 %v1736_v9, %v2121_v41  ;;  %v1738_v17 = vadd.f32 %v1705_v15, %v1671_v14  ;;  %v702_v18 = vpop.f32.mrb[23].mxu1  ;;  %v882_v19 = vpop.f32.mrb[23].mxu0 }
 0x13c   : > { %1553 = vst [vmem:[%s2130_s21 + $0x40] sm:$0xff] %v1509_v12   ;;  %v985_v20 = vadd.f32 %v1737_v13, %v2121_v41  ;;  %v1739_v21 = vadd.f32 %v882_v19, %v702_v18 }
 0x13d   : > { %v988_v22 = vadd.f32 %v1738_v17, %v2121_v41  ;;  %v1019_v24 = vmax.f32 %v987_v16, 0.0 }
 0x13e   : > { %v986_v23 = vadd.f32 %v1739_v21, %v2121_v41  ;;  %v1017_v26 = vmax.f32 %v985_v20, 0.0 }
 0x13f   : > { %v1020_v25 = vmax.f32 %v988_v22, 0.0 }
 0x140   : > { %v1018_v27 = vmax.f32 %v986_v23, 0.0  ;;  %v1674_v28 = vpop.f32.mrb[24].mxu1  ;;  %v1708_v29 = vpop.f32.mrb[24].mxu0 }
 0x141   : > { %v1524_v30 = vpack.c.bf16 %v1020_v25, %v1019_v24  ;;  %v1740_v31 = vadd.f32 %v1708_v29, %v1674_v28  ;;  %v715_v32 = vpop.f32.mrb[25].mxu1  ;;  %v895_v33 = vpop.f32.mrb[25].mxu0 }
 0x142   : > { %v1519_v34 = vpack.c.bf16 %v1018_v27, %v1017_v26  ;;  %v1741_v40 = vadd.f32 %v895_v33, %v715_v32  ;;  %v1675_v35 = vpop.f32.mrb[26].mxu1  ;;  %v1709_v42 = vpop.f32.mrb[26].mxu0 }
 0x143   : > { %1556 = vst [vmem:[%s2130_s21 + $0x58] sm:$0xff] %v1524_v30   ;;  %v991_v43 = vadd.f32 %v1740_v31, %v2121_v41  ;;  %v1742_v44 = vadd.f32 %v1709_v42, %v1675_v35  ;;  %v718_v45 = vpop.f32.mrb[27].mxu1  ;;  %v898_v46 = vpop.f32.mrb[27].mxu0 }
 0x144   : > { %1555 = vst [vmem:[%s2130_s21 + $0x50] sm:$0xff] %v1519_v34   ;;  %v989_v36 = vadd.f32 %v1741_v40, %v2121_v41  ;;  %v1743_v47 = vadd.f32 %v898_v46, %v718_v45 }
 0x145   : > { %v992_v48 = vadd.f32 %v1742_v44, %v2121_v41  ;;  %v1023_v49 = vmax.f32 %v991_v43, 0.0 }
 0x146   : > { %v990_v37 = vadd.f32 %v1743_v47, %v2121_v41  ;;  %v1021_v51 = vmax.f32 %v989_v36, 0.0 }
 0x147   : > { %v1024_v50 = vmax.f32 %v992_v48, 0.0 }
 0x148   : > { %v1022_v52 = vmax.f32 %v990_v37, 0.0  ;;  %v1678_v38 = vpop.f32.mrb[28].mxu1  ;;  %v1712_v53 = vpop.f32.mrb[28].mxu0 }
 0x149   : > { %v1534_v54 = vpack.c.bf16 %v1024_v50, %v1023_v49  ;;  %v1744_v55 = vadd.f32 %v1712_v53, %v1678_v38  ;;  %v731_v56 = vpop.f32.mrb[29].mxu1  ;;  %v911_v57 = vpop.f32.mrb[29].mxu0 }
 0x14a   : > { %v1529_v39 = vpack.c.bf16 %v1022_v52, %v1021_v51  ;;  %v1745_v58 = vadd.f32 %v911_v57, %v731_v56  ;;  %v1679_v59 = vpop.f32.mrb[30].mxu1  ;;  %v1713_v60 = vpop.f32.mrb[30].mxu0 }
 0x14b   : > { %1558 = vst [vmem:[%s2130_s21 + $0x68] sm:$0xff] %v1534_v54   ;;  %v995_v61 = vadd.f32 %v1744_v55, %v2121_v41  ;;  %v1746_v62 = vadd.f32 %v1713_v60, %v1679_v59  ;;  %v734_v63 = vpop.f32.mrb[31].mxu1  ;;  %v914_v0 = vpop.f32.mrb[31].mxu0 }
 0x14c   : > { %1557 = vst [vmem:[%s2130_s21 + $0x60] sm:$0xff] %v1529_v39   ;;  %v993_v1 = vadd.f32 %v1745_v58, %v2121_v41  ;;  %v1747_v2 = vadd.f32 %v914_v0, %v734_v63 }
 0x14d   : > { %v996_v3 = vadd.f32 %v1746_v62, %v2121_v41  ;;  %v1027_v5 = vmax.f32 %v995_v61, 0.0 }
 0x14e   : > { %v994_v4 = vadd.f32 %v1747_v2, %v2121_v41  ;;  %v1025_v7 = vmax.f32 %v993_v1, 0.0 }
 0x14f   : > { %v1028_v6 = vmax.f32 %v996_v3, 0.0 }
 0x150   : > { %v1026_v8 = vmax.f32 %v994_v4, 0.0 }
 0x151   : > { %v1544_v9 = vpack.c.bf16 %v1028_v6, %v1027_v5 }
 0x152   : > { %v1539_v10 = vpack.c.bf16 %v1026_v8, %v1025_v7 }
 0x153   : > { %1560 = vst [vmem:[%s2130_s21 + $0x78] sm:$0xff] %v1544_v9  }
 0x154   : > { %1559 = vst [vmem:[%s2130_s21 + $0x70] sm:$0xff] %v1539_v10  }
 0x155   : > { %1876 = shalt.err (!%p1873_p5)
}
 0x156   : > { %s1877_s7 = scalar_lea.hbm %s2183_s29, 2048  ;;  %s1881_s10 = scalar_lea.hbm %s2240_s3, 4096 }
 0x157   : > { %p1878_p6 = scmp.ne.s32.totalorder %s2183_s29, %s1877_s7  ;;  %p1882_p10 = scmp.lt.u32.totalorder %s2183_s29, %s2240_s3 }
 0x158   : > { %p1883_p11 = scmp.lt.u32.totalorder %s1881_s10, %s1877_s7  ;;  %p1885_p13 = scmp.lt.u32.totalorder %s1877_s7, %s2183_s29 }
 0x159   : > { %p1879_p7 = pnand %p1878_p6, %p2006_p4 }
 0x15a   : > { %p1884_p12 = por %p1883_p11, %p1882_p10 }
 0x15b   : > { %p1880_p9 = pneg %p1879_p7 }
 0x15c   : > { %p1886_p0 = por %p1885_p13, %p1884_p12 }
 0x15e   : > { %p1887_p1 = pnand %p1886_p0, %p1880_p9 }
 0x160   : > { %1890 = shalt.err (!%p1887_p1)
}
 0x161   : > { %s1944_s19 = smov 64   ;;  %s1945_s21 = smov 4  }
 0x162   : > { %1785 = dma.vmem_to_hbm [thread:$0]  (%p2006_p4), %s2185_s26, 2048, %s2183_s29, %s2191_s15, %s1944_s19, %s1944_s19, %s1945_s21  }
 0x163 PF: > { %p1791_p2 = scmp.ge.s32.totalorder %s1941_s17, 2  ;;  %s1222_s23 = sand.u32 1, %s1921_s12  }
 0x164   : > { %s1223_s27 = scalar_lea.sflag [#allocation3], %s1222_s23 }
 0x165   : > { %p1788_p3 = pnand %p1791_p2, %p2013_p8 }
 0x167   : > { %1916 = dma.done.wait (!%p1788_p3), %s1223_s27, 2048  }
 0x168   : > { %1918 = vsyncadd (!%p1788_p3), %s1223_s27, 4294965248  ;;  %s16_s17 = sadd.s32 1, %s1941_s17   ;;  %s2243_s12 = smov %s1925_s13 }
 0x169   : > { %p13_p5 = scmp.ge.s32.totalorder %s16_s17, 4   ;;  %s2244_s13 = smov %s1929_s14 }
 0x16a   : > { %s2245_s14 = smov %s2019_s25  ;;  %s2246_s15 = smov %s1937_s16 }
 0x16b   : > { %s2247_s16 = smov %s2249_s20  ;;  %15 = sbr.rel (!%p13_p5) target bundleno = 4 (0x4), region = 76 }
 0x172   :  { %1228 = vsyncpa [#allocation3], 1 }
 0x173   :  { %1230 = vsyncpa [#allocation3 + $0x1], 1 }

</bundles_post_ra>
